<compile_context>
chip_gen: v7x
topology: tpu7x:2x2x1
jax: 0.10.0
libtpu: 0.0.40
codegen_flags: <defaults>
</compile_context>

<pallas_src>
import functools

import jax
import jax.numpy as jnp
from jax.experimental import pallas as pl
from jax.experimental.pallas import tpu as pltpu

_LANE = 128
_SUBLANE_BF16 = 16


# ------------------------------- small helpers ------------------------------ #

def _round_up(x, m):
    return ((x + m - 1) // m) * m


def _pad2(a, rows, cols):
    r, c = a.shape
    if r == rows and c == cols:
        return a
    return jnp.pad(a, ((0, rows - r), (0, cols - c)))


def _pad1(a, n):
    if a.shape[0] == n:
        return a
    return jnp.pad(a, ((0, n - a.shape[0]),))


@functools.lru_cache(maxsize=None)
def _vmem_capacity():
    """Physical VMEM bytes per TensorCore (conservative fallback = v7x, 64 MiB)."""
    try:
        return int(pltpu.get_tpu_info().vmem_capacity_bytes)
    except Exception:
        return 64 << 20


def _pick_tile(dim, pref, align):
    """Largest tile <= pref that is a multiple of `align` and divides `dim`;
    falls back to the full dim (always legal per the (8,128) rule)."""
    t = min(pref, dim)
    t = (t // align) * align
    while t >= align:
        if dim % t == 0:
            return t
        t -= align
    return dim


def _activate(y, activation):
    if activation == "gelu":
        # tanh-approximate GELU, exactly as the reference `gelu` function.
        c = jnp.float32(0.7978845608028654)  # sqrt(2/pi)
        return 0.5 * y * (1.0 + jnp.tanh(c * (y + 0.044715 * y * y * y)))
    if activation == "relu":
        return jnp.maximum(y, 0.0)
    if activation == "tanh":
        return jnp.tanh(y)
    if activation == "sigmoid":
        return jax.nn.sigmoid(y)
    return y


def _weight_spec(shape, index_map, depth):
    """BlockSpec for the weight stream, with optional 3-deep buffering."""
    if depth > 2:
        try:
            return pl.BlockSpec(shape, index_map, pipeline_mode=pl.Buffered(depth))
        except Exception:  # pragma: no cover - older API fallback
            pass
    return pl.BlockSpec(shape, index_map)


# ------------------------- fused whole-MLP kernel --------------------------- #

def _mlp_fused_kernel(x_ref, *refs, has_ln, activation, eps, ln_inv_n):
    """One grid step = one batch tile through ALL layers (weights VMEM-resident)."""
    o_ref = refs[-1]
    p = refs[:-1]
    h = x_ref[...]                                   # bf16 (tm, K0p)
    idx = 0
    n_layers = len(has_ln)
    for i in range(n_layers):
        w_ref, b_ref = p[idx], p[idx + 1]
        idx += 2
        y = jnp.dot(h, w_ref[...], preferred_element_type=jnp.float32)
        y = y + b_ref[...].astype(jnp.float32)
        # Dropout is the identity at inference.
        # TODO(synk): training-mode dropout (pltpu.prng_random_bits mask) not implemented.
        if i < n_layers - 1:
            if has_ln[i]:
                g_ref, be_ref = p[idx], p[idx + 1]
                idx += 2
                # Padded feature columns are exactly zero, so sums over the padded
                # row divided by the REAL feature count give exact LN statistics.
                mu = jnp.sum(y, axis=-1, keepdims=True) * ln_inv_n[i]
                msq = jnp.sum(y * y, axis=-1, keepdims=True) * ln_inv_n[i]
                var = msq - mu * mu
                y = (y - mu) * jax.lax.rsqrt(var + eps)
                y = y * g_ref[...].astype(jnp.float32) + be_ref[...].astype(jnp.float32)
            y = _activate(y, activation)
            h = y.astype(jnp.bfloat16)               # keep the MXU fast path
        else:
            o_ref[...] = y.astype(o_ref.dtype)


def _fused_tm(m_pad):
    tm = _pick_tile(m_pad, 256, _SUBLANE_BF16)
    # Prefer >=2 parallel grid blocks (v7x megacore) while keeping 16-alignment.
    while m_pad // tm < 2 and tm % 32 == 0:
        tm //= 2
    return tm


def _fused_footprint(layers, tm, k0p):
    n_out_p = layers[-1]["w"].shape[1]
    total = 2 * tm * k0p * 2                      # x tile (double-buffered, bf16)
    total += 2 * tm * n_out_p * 4                 # out tile (double-buffered, f32)
    max_np = k0p
    for l in layers:
        kp, np_ = l["w"].shape
        max_np = max(max_np, np_)
        total += 2 * (kp * np_ * 2 + np_ * 4)     # weight (bf16) + bias (f32)
        if "ln_g" in l:
            total += 2 * (2 * np_ * 2)            # gamma/beta (bf16)
    total += 2 * tm * max_np * 6                  # live intermediates (f32 y + bf16 h)
    return total


def _fused_fits(layers, m_pad, k0p):
    tm = _fused_tm(m_pad)
    return _fused_footprint(layers, tm, k0p) <= int(_vmem_capacity() * 0.4)


def _mlp_fused(layers, x_pad, *, activation, eps):
    m_pad, k0p = x_pad.shape
    n_out_p = layers[-1]["w"].shape[1]
    tm = _fused_tm(m_pad)

    args = [x_pad]
    in_specs = [pl.BlockSpec((tm, k0p), lambda i: (i, 0))]
    for layer in layers:
        kp, np_ = layer["w"].shape
        args.append(layer["w"])
        in_specs.append(pl.BlockSpec((kp, np_), lambda i: (0, 0)))
        args.append(layer["b"])
        in_specs.append(pl.BlockSpec((1, np_), lambda i: (0, 0)))
        if "ln_g" in layer:
            args += [layer["ln_g"], layer["ln_b"]]
            in_specs += [pl.BlockSpec((1, np_), lambda i: (0, 0))] * 2

    has_ln = tuple("ln_g" in l for l in layers)
    ln_inv_n = tuple(1.0 / float(l["n_out"]) for l in layers)

    cap = _vmem_capacity()
    fp = _fused_footprint(layers, tm, k0p)
    vmem_limit = min(int(cap * 0.9), max(2 * fp, 32 << 20))

    kernel = functools.partial(_mlp_fused_kernel, has_ln=has_ln,
                               activation=activation, eps=eps, ln_inv_n=ln_inv_n)

    return pl.pallas_call(
        kernel,
        out_shape=jax.ShapeDtypeStruct((m_pad, n_out_p), jnp.float32),
        grid=(m_pad // tm,),
        in_specs=in_specs,
        out_specs=pl.BlockSpec((tm, n_out_p), lambda i: (i, 0)),
        compiler_params=pltpu.CompilerParams(
            dimension_semantics=("parallel",),
            vmem_limit_bytes=vmem_limit),
    )(*args)


# ---------------------- per-layer tiled linear (fallback) ------------------- #

def _linear_kernel(*refs, activation, fuse_ln, eps, ln_inv_n, use_acc):
    """Fused  out = epilogue(x @ w + b)  with K-axis accumulation.

    refs = (x, w, b[, gamma, beta], out[, acc_scratch])
    Grid: (M//tm, N//tn, K//tk); axis 2 is the reduction ("arbitrary").
    When the output dtype is f32 the accumulation happens directly in o_ref
    (no separate scratch).
    """
    if fuse_ln:
        if use_acc:
            x_ref, w_ref, b_ref, g_ref, be_ref, o_ref, acc_ref = refs
        else:
            x_ref, w_ref, b_ref, g_ref, be_ref, o_ref = refs
            acc_ref = o_ref
    else:
        if use_acc:
            x_ref, w_ref, b_ref, o_ref, acc_ref = refs
        else:
            x_ref, w_ref, b_ref, o_ref = refs
            acc_ref = o_ref
        g_ref = be_ref = None

    k = pl.program_id(2)

    @pl.when(k == 0)
    def _init():
        acc_ref[...] = jnp.zeros_like(acc_ref)

    acc_ref[...] += jnp.dot(x_ref[...], w_ref[...],
                            preferred_element_type=jnp.float32)

    @pl.when(k == pl.num_programs(2) - 1)
    def _finalize():
        y = acc_ref[...].astype(jnp.float32) + b_ref[...].astype(jnp.float32)
        # Dropout is the identity at inference.
        if fuse_ln:
            mu = jnp.sum(y, axis=-1, keepdims=True) * ln_inv_n
            msq = jnp.sum(y * y, axis=-1, keepdims=True) * ln_inv_n
            var = msq - mu * mu
            y = (y - mu) * jax.lax.rsqrt(var + eps)
            y = y * g_ref[...].astype(jnp.float32) + be_ref[...].astype(jnp.float32)
        y = _activate(y, activation)
        o_ref[...] = y.astype(o_ref.dtype)


def linear(x, w, b, *, out_dtype, activation="none",
           ln_gamma=None, ln_beta=None, ln_true_n=None, eps=1e-5):
    """Fused linear layer on pre-padded, pre-cast operands:
    x (M, K) bf16, w (K, N) bf16, b (1, N) f32 -> (M, N) in `out_dtype`."""
    M, K = x.shape
    Kw, N = w.shape
    assert K == Kw
    fuse_ln = ln_gamma is not None

    cap = _vmem_capacity()
    big = cap >= (96 << 20)            # v5e / v6e have 128 MiB VMEM, v7x has 64 MiB

    if fuse_ln:
        # LayerNorm epilogue needs the full feature row resident.
        # TODO(synk): streaming sum/sumsq scratch would remove the tn=N constraint.
        tn = N
        pm, pk = (256, 512) if big else (128, 256)
    else:
        pm, pn, pk = (512, 1024, 1024) if big else (256, 512, 512)
        tn = _pick_tile(N, pn, _LANE)
    tm = _pick_tile(M, pm, _SUBLANE_BF16)
    tk = _pick_tile(K, pk, _LANE)

    out_bytes = jnp.dtype(out_dtype).itemsize
    use_acc = jnp.dtype(out_dtype) != jnp.dtype(jnp.float32)

    def footprint(tm_, tn_, tk_, depth):
        f = 2 * tm_ * tk_ * 2 + depth * tk_ * tn_ * 2 + 2 * tm_ * tn_ * out_bytes
        if use_acc:
            f += tm_ * tn_ * 4
        f += 2 * 3 * tn_ * 4
        return f

    budget = int(cap * 0.45)
    while footprint(tm, tn, tk, 2) > budget:
        if tk > _LANE:
            tk //= 2
        elif tm > _SUBLANE_BF16 and tm % 32 == 0:
            tm //= 2
        elif (not fuse_ln) and tn > _LANE and tn % 256 == 0:
            tn //= 2
        else:
            break

    # Give the v7x megacore >=2 parallel grid blocks when the shape allows it.
    if (M // tm) * (N // tn) < 2:
        if tm % 32 == 0:
            tm //= 2
        elif (not fuse_ln) and tn % 256 == 0:
            tn //= 2

    w_depth = 3 if (K // tk > 2 and footprint(tm, tn, tk, 3) <= budget) else 2
    vmem_limit = min(int(cap * 0.9), max(2 * footprint(tm, tn, tk, w_depth), 32 << 20))

    grid = (M // tm, N // tn, K // tk)

    in_specs = [
        pl.BlockSpec((tm, tk), lambda i, j, k: (i, k)),
        _weight_spec((tk, tn), lambda i, j, k: (k, j), w_depth),
        pl.BlockSpec((1, tn), lambda i, j, k: (0, j)),
    ]
    args = [x, w, b]
    if fuse_ln:
        in_specs += [pl.BlockSpec((1, tn), lambda i, j, k: (0, j))] * 2
        args += [ln_gamma, ln_beta]

    scratch = [pltpu.VMEM((tm, tn), jnp.float32)] if use_acc else []

    kernel = functools.partial(
        _linear_kernel, activation=activation, fuse_ln=fuse_ln, eps=eps,
        ln_inv_n=(1.0 / float(ln_true_n)) if fuse_ln else 1.0, use_acc=use_acc)

    return pl.pallas_call(
        kernel,
        out_shape=jax.ShapeDtypeStruct((M, N), out_dtype),
        grid=grid,
        in_specs=in_specs,
        out_specs=pl.BlockSpec((tm, tn), lambda i, j, k: (i, j)),
        scratch_shapes=scratch,
        compiler_params=pltpu.CompilerParams(
            dimension_semantics=("parallel", "parallel", "arbitrary"),
            vmem_limit_bytes=vmem_limit),
    )(*args)


# ---------------------------- MLP params / forward -------------------------- #

def init_mlp_params(key, input_size, hidden_size, output_size, num_layers,
                    layer_norm=False, init_last_layer_bias_to_zero=False):
    """Mirrors nn.Linear default init (uniform +-1/sqrt(fan_in)).

    Weights / LN params are cast to bf16 ONCE here, and all feature dims are
    zero-padded to multiples of 128 so every kernel store is lane-dense."""
    layers = []
    keys = jax.random.split(key, num_layers + 1)
    for i in range(num_layers + 1):
        n_in = input_size if i == 0 else hidden_size
        n_out = hidden_size if i < num_layers else output_size
        kw, kb = jax.random.split(keys[i])
        bound = 1.0 / (n_in ** 0.5)
        w = jax.random.uniform(kw, (n_in, n_out), jnp.float32, -bound, bound)
        b = jax.random.uniform(kb, (n_out,), jnp.float32, -bound, bound)
        if i == num_layers and init_last_layer_bias_to_zero:
            b = jnp.zeros_like(b)
        kp, np_ = _round_up(n_in, _LANE), _round_up(n_out, _LANE)
        layer = {
            "w": _pad2(w, kp, np_).astype(jnp.bfloat16),
            "b": _pad1(b, np_).reshape(1, np_).astype(jnp.float32),
            "n_in": n_in,
            "n_out": n_out,
        }
        if layer_norm and i < num_layers:
            layer["ln_g"] = _pad1(jnp.ones((n_out,), jnp.float32),
                                  np_).reshape(1, np_).astype(jnp.bfloat16)
            layer["ln_b"] = jnp.zeros((1, np_), jnp.bfloat16)
        layers.append(layer)
    return layers


def mlp_forward(layers, x, *, activation="none", eps=1e-5, force_unfused=False):
    """Forward pass of the MLP module.

    NOTE: the provided MLP.__init__ never adds the activation module to the
    Sequential, so the reference forward applies no inter-layer activation
    (default here: activation="none").  Dropout is identity at inference.
    # TODO(synk): inference BatchNorm1d (running-stats affine) not implemented
    #             (spec default batch_norm=False).
    """
    lead = x.shape[:-1]
    n_out_final = layers[-1]["n_out"]
    h = x.reshape(-1, x.shape[-1])
    M = h.shape[0]
    assert h.shape[1] == layers[0]["n_in"]

    m_pad = _round_up(max(M, _SUBLANE_BF16), _SUBLANE_BF16)
    k0p = layers[0]["w"].shape[0]
    # Single bf16 cast + zero pad per forward (padded rows/cols are sliced away).
    h = jnp.pad(h, ((0, m_pad - M), (0, k0p - h.shape[1]))).astype(jnp.bfloat16)

    if (not force_unfused) and _fused_fits(layers, m_pad, k0p):
        out = _mlp_fused(layers, h, activation=activation, eps=eps)
    else:
        last = len(layers) - 1
        for i, layer in enumerate(layers):
            is_last = i == last
            h = linear(
                h, layer["w"], layer["b"],
                out_dtype=jnp.float32 if is_last else jnp.bfloat16,
                activation="none" if is_last else activation,
                ln_gamma=layer.get("ln_g"), ln_beta=layer.get("ln_b"),
                ln_true_n=layer["n_out"], eps=eps)
        out = h

    out = out[:M, :n_out_final].astype(jnp.float32)
    return out.reshape(lead + (n_out_final,))


# ---------------------------------- main ------------------------------------ #

if __name__ == "__main__":
    key = jax.random.PRNGKey(0)
    k_par, k_par_ln, k_x = jax.random.split(key, 3)

    batch, input_size, hidden_size, output_size, num_layers = 16, 32, 64, 24, 2
    x = jax.random.normal(k_x, (batch, input_size), jnp.float32)

    # Spec defaults: dropout=0.1 (identity at inference), batch_norm=False,
    # layer_norm=False, activation never applied by the given __init__.
    params = init_mlp_params(k_par, input_size, hidden_size, output_size, num_layers)
    out = mlp_forward(params, x)                               # fused single-kernel path
    out_unfused = mlp_forward(params, x, force_unfused=True)   # per-layer tiled path

    # layer_norm=True variant exercises the fused LayerNorm epilogue.
    params_ln = init_mlp_params(k_par_ln, input_size, hidden_size, output_size,
                                num_layers, layer_norm=True,
                                init_last_layer_bias_to_zero=True)
    out_ln = mlp_forward(params_ln, x)
    out_ln_unfused = mlp_forward(params_ln, x, force_unfused=True)

    jax.block_until_ready((out, out_unfused, out_ln, out_ln_unfused))

    assert out.shape == (batch, output_size)
    assert out_ln.shape == (batch, output_size)
    assert bool(jnp.all(jnp.isfinite(out)))
    assert bool(jnp.all(jnp.isfinite(out_ln)))

    # Fused whole-MLP kernel and per-layer tiled kernels must agree.
    assert jnp.allclose(out, out_unfused, rtol=2e-2, atol=2e-2)
    assert jnp.allclose(out_ln, out_ln_unfused, rtol=5e-2, atol=5e-2)

    # Pure-JAX reference using the same bf16-operand / f32-accumulate contract
    # (intermediate activations in bf16, final output in f32).
    def ref_forward(layers, x_in):
        h = x_in.astype(jnp.bfloat16)
        y = None
        for i, l in enumerate(layers):
            n_in, n_out = l["n_in"], l["n_out"]
            w = l["w"][:n_in, :n_out]
            b = l["b"][0, :n_out]
            y = jnp.dot(h, w, preferred_element_type=jnp.float32) + b
            if i < len(layers) - 1:
                if "ln_g" in l:
                    g = l["ln_g"][0, :n_out].astype(jnp.float32)
                    be = l["ln_b"][0, :n_out].astype(jnp.float32)
                    mu = jnp.mean(y, axis=-1, keepdims=True)
                    var = jnp.mean(jnp.square(y - mu), axis=-1, keepdims=True)
                    y = (y - mu) * jax.lax.rsqrt(var + 1e-5) * g + be
                h = y.astype(jnp.bfloat16)
        return y

    ref = ref_forward(params, x)
    ref_ln = ref_forward(params_ln, x)
    assert jnp.allclose(out, ref, rtol=2e-2, atol=2e-2)
    assert jnp.allclose(out_ln, ref_ln, rtol=5e-2, atol=5e-2)

    print("KERNEL_OK")
</pallas_src>

<mosaic_0001>
module attributes {stable_mosaic.version = 11 : i64} {
  func.func @_mlp_fused_kernel(%arg0: i32, %arg1: memref<16x128xbf16, #tpu.memory_space<vmem>>, %arg2: memref<128x128xbf16, #tpu.memory_space<vmem>>, %arg3: memref<1x128xf32, #tpu.memory_space<vmem>>, %arg4: memref<128x128xbf16, #tpu.memory_space<vmem>>, %arg5: memref<1x128xf32, #tpu.memory_space<vmem>>, %arg6: memref<128x128xbf16, #tpu.memory_space<vmem>>, %arg7: memref<1x128xf32, #tpu.memory_space<vmem>>, %arg8: memref<16x128xf32, #tpu.memory_space<vmem>>) attributes {dimension_semantics = [#tpu.dimension_semantics<parallel>], iteration_bounds = array<i64: 1>, scalar_prefetch = 0 : i64, scratch_operands = 0 : i64, tpu.core_type = #tpu.core_type<tc>, window_params = [{transform_indices = @transform_0, window_bounds = array<i64: 16, 128>}, {pipeline_mode = #tpu.pipeline_mode<synchronous>, transform_indices = @transform_1, window_bounds = array<i64: 128, 128>}, {pipeline_mode = #tpu.pipeline_mode<synchronous>, transform_indices = @transform_2, window_bounds = array<i64: 1, 128>}, {pipeline_mode = #tpu.pipeline_mode<synchronous>, transform_indices = @transform_3, window_bounds = array<i64: 128, 128>}, {pipeline_mode = #tpu.pipeline_mode<synchronous>, transform_indices = @transform_4, window_bounds = array<i64: 1, 128>}, {pipeline_mode = #tpu.pipeline_mode<synchronous>, transform_indices = @transform_5, window_bounds = array<i64: 128, 128>}, {pipeline_mode = #tpu.pipeline_mode<synchronous>, transform_indices = @transform_6, window_bounds = array<i64: 1, 128>}, {transform_indices = @transform_7, window_bounds = array<i64: 16, 128>}]} {
    %c0 = arith.constant 0 : index
    %c0_0 = arith.constant 0 : index
    %0 = vector.load %arg1[%c0, %c0_0] : memref<16x128xbf16, #tpu.memory_space<vmem>>, vector<16x128xbf16>
    %c0_1 = arith.constant 0 : index
    %c0_2 = arith.constant 0 : index
    %1 = vector.load %arg2[%c0_1, %c0_2] : memref<128x128xbf16, #tpu.memory_space<vmem>>, vector<128x128xbf16>
    %cst = arith.constant dense<0.000000e+00> : vector<16x128xf32>
    %2 = tpu.matmul %0, %1, %cst {dimension_numbers = #tpu.dot_dimension_numbers<[1], [0], [0], [1], [0, 0, 1, 1], [], []>} : vector<16x128xbf16>, vector<128x128xbf16>, vector<16x128xf32> -> vector<16x128xf32>
    %c0_3 = arith.constant 0 : index
    %c0_4 = arith.constant 0 : index
    %3 = vector.load %arg3[%c0_3, %c0_4] : memref<1x128xf32, #tpu.memory_space<vmem>>, vector<1x128xf32>
    %4 = vector.broadcast %3 : vector<1x128xf32> to vector<16x128xf32>
    %5 = arith.addf %2, %4 : vector<16x128xf32>
    %6 = arith.truncf %5 : vector<16x128xf32> to vector<16x128xbf16>
    %c0_5 = arith.constant 0 : index
    %c0_6 = arith.constant 0 : index
    %7 = vector.load %arg4[%c0_5, %c0_6] : memref<128x128xbf16, #tpu.memory_space<vmem>>, vector<128x128xbf16>
    %cst_7 = arith.constant dense<0.000000e+00> : vector<16x128xf32>
    %8 = tpu.matmul %6, %7, %cst_7 {dimension_numbers = #tpu.dot_dimension_numbers<[1], [0], [0], [1], [0, 0, 1, 1], [], []>} : vector<16x128xbf16>, vector<128x128xbf16>, vector<16x128xf32> -> vector<16x128xf32>
    %c0_8 = arith.constant 0 : index
    %c0_9 = arith.constant 0 : index
    %9 = vector.load %arg5[%c0_8, %c0_9] : memref<1x128xf32, #tpu.memory_space<vmem>>, vector<1x128xf32>
    %10 = vector.broadcast %9 : vector<1x128xf32> to vector<16x128xf32>
    %11 = arith.addf %8, %10 : vector<16x128xf32>
    %12 = arith.truncf %11 : vector<16x128xf32> to vector<16x128xbf16>
    %c0_10 = arith.constant 0 : index
    %c0_11 = arith.constant 0 : index
    %13 = vector.load %arg6[%c0_10, %c0_11] : memref<128x128xbf16, #tpu.memory_space<vmem>>, vector<128x128xbf16>
    %cst_12 = arith.constant dense<0.000000e+00> : vector<16x128xf32>
    %14 = tpu.matmul %12, %13, %cst_12 {dimension_numbers = #tpu.dot_dimension_numbers<[1], [0], [0], [1], [0, 0, 1, 1], [], []>} : vector<16x128xbf16>, vector<128x128xbf16>, vector<16x128xf32> -> vector<16x128xf32>
    %c0_13 = arith.constant 0 : index
    %c0_14 = arith.constant 0 : index
    %15 = vector.load %arg7[%c0_13, %c0_14] : memref<1x128xf32, #tpu.memory_space<vmem>>, vector<1x128xf32>
    %16 = vector.broadcast %15 : vector<1x128xf32> to vector<16x128xf32>
    %17 = arith.addf %14, %16 : vector<16x128xf32>
    %c0_15 = arith.constant 0 : index
    %c0_16 = arith.constant 0 : index
    %18 = vector.load %arg8[%c0_15, %c0_16] : memref<16x128xf32, #tpu.memory_space<vmem>>, vector<16x128xf32>
    tpu.vector_store %arg8[%c0_15, %c0_16], %17 {strides = array<i32>} : memref<16x128xf32, #tpu.memory_space<vmem>>, vector<16x128xf32>,
    return
  }
  func.func @transform_0(%arg0: i32) -> (i32, i32) {
    %c0_i32 = arith.constant 0 : i32
    %c0_i32_0 = arith.constant 0 : i32
    return %arg0, %c0_i32 : i32, i32
  }
  func.func @transform_1(%arg0: i32) -> (i32, i32) {
    %c0_i32 = arith.constant 0 : i32
    %c0_i32_0 = arith.constant 0 : i32
    %c0_i32_1 = arith.constant 0 : i32
    return %c0_i32, %c0_i32_0 : i32, i32
  }
  func.func @transform_2(%arg0: i32) -> (i32, i32) {
    %c0_i32 = arith.constant 0 : i32
    %c0_i32_0 = arith.constant 0 : i32
    %c0_i32_1 = arith.constant 0 : i32
    return %c0_i32, %c0_i32_0 : i32, i32
  }
  func.func @transform_3(%arg0: i32) -> (i32, i32) {
    %c0_i32 = arith.constant 0 : i32
    %c0_i32_0 = arith.constant 0 : i32
    %c0_i32_1 = arith.constant 0 : i32
    return %c0_i32, %c0_i32_0 : i32, i32
  }
  func.func @transform_4(%arg0: i32) -> (i32, i32) {
    %c0_i32 = arith.constant 0 : i32
    %c0_i32_0 = arith.constant 0 : i32
    %c0_i32_1 = arith.constant 0 : i32
    return %c0_i32, %c0_i32_0 : i32, i32
  }
  func.func @transform_5(%arg0: i32) -> (i32, i32) {
    %c0_i32 = arith.constant 0 : i32
    %c0_i32_0 = arith.constant 0 : i32
    %c0_i32_1 = arith.constant 0 : i32
    return %c0_i32, %c0_i32_0 : i32, i32
  }
  func.func @transform_6(%arg0: i32) -> (i32, i32) {
    %c0_i32 = arith.constant 0 : i32
    %c0_i32_0 = arith.constant 0 : i32
    %c0_i32_1 = arith.constant 0 : i32
    return %c0_i32, %c0_i32_0 : i32, i32
  }
  func.func @transform_7(%arg0: i32) -> (i32, i32) {
    %c0_i32 = arith.constant 0 : i32
    %c0_i32_0 = arith.constant 0 : i32
    return %arg0, %c0_i32 : i32, i32
  }
}

</mosaic_0001>

<bundles_post_ra>
// kernel: tpu_custom_call.1
= control target key start
LH: loop header
LB: loop body
LE: loop exit
PB: predicated region body
PF: predicated region fallthrough
CT: control target
= control target key end

     0   :  { %12 = vsyncpa [#allocation3], 0  ;;  %s895_s0 = inlined_call_operand.hbm [shape: bf16[16,128], index: 0, kind: input, shape index: {}]   ;;  %s896_s1 = inlined_call_operand.hbm [shape: bf16[128,128], index: 1, kind: input, shape index: {}]   ;;  %s897_s2 = inlined_call_operand.vmem [shape: f32[1,128], index: 2, kind: input, shape index: {}]   ;;  %s898_s3 = inlined_call_operand.hbm [shape: bf16[128,128], index: 3, kind: input, shape index: {}]   ;;  %s899_s4 = inlined_call_operand.vmem [shape: f32[1,128], index: 4, kind: input, shape index: {}]   ;;  %s900_s5 = inlined_call_operand.hbm [shape: bf16[128,128], index: 5, kind: input, shape index: {}]   ;;  %s901_s6 = inlined_call_operand.vmem [shape: f32[1,128], index: 6, kind: input, shape index: {}]   ;;  %s902_s7 = inlined_call_operand.hbm [shape: f32[16,128], index: 7, kind: output, shape index: {}]  }
   0x1   :  { %13 = vsyncpa [#allocation6], 0 }
   0x2   :  { %14 = vsyncpa [#allocation9], 0 }
   0x3   :  { %15 = vsyncpa [#allocation4], 0  ;;  %s719_s24 = smov [#allocation5]   ;;  %s720_s26 = smov [#allocation2]  }
   0x4   :  { %s33_s25 = sshll.u32 %s719_s24, 4  ;;  %s21_s27 = sshll.u32 %s720_s26, 4  ;;  %s34_s25 = int_to_ptr.vmem [resolvable:$true] %s33_s25  ;;  %s770_s27 = int_to_ptr.vmem [resolvable:$true] %s21_s27 }
   0x5   :  { %s601_s30 = scalar_lea.hbm %s896_s1, 1024 }
   0x6   :  { %p602_p0 = scmp.ne.s32.totalorder %s896_s1, %s601_s30  ;;  %p605_p1 = scmp.lt.u32.totalorder %s601_s30, %s896_s1 }
   0x8   :  { %p607_p2 = pnand %p605_p1, %p602_p0 }
   0xa   :  { %610 = shalt.err (!%p607_p2)
}
   0xb   :  { %s611_s12 = scalar_lea.vmem %s34_s25, 1024  ;;  %p616_p4 = scmp.lt.s32.totalorder %s34_s25, %s34_s25 }
   0xc   :  { %p612_p3 = scmp.ne.s32.totalorder %s34_s25, %s611_s12  ;;  %p617_p5 = scmp.lt.s32.totalorder %s611_s12, %s611_s12 }
   0xe   :  { %p618_p6 = por %p617_p5, %p616_p4 }
  0x10   :  { %p619_p7 = pnand %p618_p6, %p612_p3 }
  0x12   :  { %622 = shalt.err (!%p619_p7)
}
  0x13   :  { %s721_s13 = smov 64   ;;  %s722_s14 = smov 4  }
  0x14   :  { %39 = dma.hbm_to_vmem [thread:$0]  %s896_s1, 1024, %s34_s25, [#allocation6], %s721_s13, %s721_s13, %s722_s14  }
  0x15   :  { %s623_s19 = scalar_lea.hbm %s895_s0, 128 }
  0x16   :  { %p624_p8 = scmp.ne.s32.totalorder %s895_s0, %s623_s19  ;;  %p627_p9 = scmp.lt.u32.totalorder %s623_s19, %s895_s0 }
  0x18   :  { %p629_p10 = pnand %p627_p9, %p624_p8 }
  0x1a   :  { %632 = shalt.err (!%p629_p10)
}
  0x1b   :  { %s633_s24 = scalar_lea.vmem %s770_s27, 128  ;;  %p638_p12 = scmp.lt.s32.totalorder %s770_s27, %s770_s27 }
  0x1c   :  { %p634_p11 = scmp.ne.s32.totalorder %s770_s27, %s633_s24  ;;  %p639_p13 = scmp.lt.s32.totalorder %s633_s24, %s633_s24 }
  0x1e   :  { %p640_p0 = por %p639_p13, %p638_p12 }
  0x20   :  { %p641_p1 = pnand %p640_p0, %p634_p11 }
  0x22   :  { %644 = shalt.err (!%p641_p1)
}
  0x23   :  { %27 = dma.hbm_to_vmem [thread:$0]  %s895_s0, 128, %s770_s27, [#allocation3], %s721_s13, %s721_s13, %s722_s14  }
  0x24   :  { %s723_s26 = smov [#allocation7]   ;;  %s724_s29 = smov [#allocation8]  }
  0x25   :  { %s47_s28 = sshll.u32 %s723_s26, 4  ;;  %s61_s30 = sshll.u32 %s724_s29, 4  ;;  %s48_s28 = int_to_ptr.vmem [resolvable:$true] %s47_s28  ;;  %s807_s30 = int_to_ptr.vmem [resolvable:$true] %s61_s30 }
  0x26   :  { %s645_s10 = scalar_lea.hbm %s898_s3, 1024 }
  0x27   :  { %p646_p2 = scmp.ne.s32.totalorder %s898_s3, %s645_s10  ;;  %p649_p3 = scmp.lt.u32.totalorder %s645_s10, %s898_s3 }
  0x29   :  { %p651_p4 = pnand %p649_p3, %p646_p2 }
  0x2b   :  { %654 = shalt.err (!%p651_p4)
}
  0x2c   :  { %s655_s0 = scalar_lea.vmem %s48_s28, 1024  ;;  %p660_p6 = scmp.lt.s32.totalorder %s48_s28, %s48_s28 }
  0x2d   :  { %p656_p5 = scmp.ne.s32.totalorder %s48_s28, %s655_s0  ;;  %p661_p7 = scmp.lt.s32.totalorder %s655_s0, %s655_s0 }
  0x2f   :  { %p662_p8 = por %p661_p7, %p660_p6 }
  0x31   :  { %p663_p9 = pnand %p662_p8, %p656_p5 }
  0x33   :  { %666 = shalt.err (!%p663_p9)
}
  0x34   :  { %53 = dma.hbm_to_vmem [thread:$0]  %s898_s3, 1024, %s48_s28, [#allocation6], %s721_s13, %s721_s13, %s722_s14  }
  0x35   :  { %s667_s20 = scalar_lea.hbm %s900_s5, 1024 }
  0x36   :  { %p668_p10 = scmp.ne.s32.totalorder %s900_s5, %s667_s20  ;;  %p671_p11 = scmp.lt.u32.totalorder %s667_s20, %s900_s5 }
  0x38   :  { %p673_p12 = pnand %p671_p11, %p668_p10 }
  0x3a   :  { %676 = shalt.err (!%p673_p12)
}
  0x3b   :  { %s677_s1 = scalar_lea.vmem %s807_s30, 1024  ;;  %p682_p0 = scmp.lt.s32.totalorder %s807_s30, %s807_s30 }
  0x3c   :  { %p678_p13 = scmp.ne.s32.totalorder %s807_s30, %s677_s1  ;;  %p683_p1 = scmp.lt.s32.totalorder %s677_s1, %s677_s1 }
  0x3e   :  { %p684_p2 = por %p683_p1, %p682_p0 }
  0x40   :  { %p685_p3 = pnand %p684_p2, %p678_p13 }
  0x42   :  { %688 = shalt.err (!%p685_p3)
}
  0x43   :  { %67 = dma.hbm_to_vmem [thread:$0]  %s900_s5, 1024, %s807_s30, [#allocation9], %s721_s13, %s721_s13, %s722_s14  }
  0x44   :  { %711 = dma.done.wait [#allocation3], 128  }
  0x45   :  { %712 = vsyncadd [#allocation3], 4294967168 }
  0x46   :  { %713 = dma.done.wait [#allocation6], 2048  }
  0x47   :  { %714 = vsyncadd [#allocation6], 4294965248 }
  0x48   :  { %715 = dma.done.wait [#allocation9], 1024  }
  0x49   :  { %716 = vsyncadd [#allocation9], 4294966272  ;;  %v725_v0 = vmov 0.0   ;;  %vm726_vm0 = vmmov 0   ;;  %v576_v1 = vld [vmem:[#allocation5] sm:$0xff]   ;;  %v577_v2 = vld [vmem:[#allocation5 + $0x8] sm:$0xff]  }
  0x4a   :  { %505 = vmatprep.subr.bf16.mxu0 %v725_v0  ;;  %521 = vmatprep.mubr.msk.bf16.mxu0 %vm726_vm0, %v725_v0  ;;  %v578_v3 = vld [vmem:[#allocation5 + $0x10] sm:$0xff]   ;;  %v585_v4 = vld [vmem:[#allocation7] sm:$0xff]   ;;  %v579_v5 = vld [vmem:[#allocation5 + $0x18] sm:$0xff]   ;;  %s727_s29 = smov [#allocation10]  }
  0x4b   :  { %525 = vmatprep.subr.bf16.mxu1 %v725_v0  ;;  %541 = vmatprep.mubr.msk.bf16.mxu1 %vm726_vm0, %v725_v0  ;;  %v586_v6 = vld [vmem:[#allocation7 + $0x8] sm:$0xff]   ;;  %v580_v7 = vld [vmem:[#allocation5 + $0x20] sm:$0xff]   ;;  %v587_v8 = vld [vmem:[#allocation7 + $0x10] sm:$0xff]   ;;  %s436_s30 = sshll.u32 %s727_s29, 4  ;;  %s437_s30 = int_to_ptr.vmem [resolvable:$true] %s436_s30 }
  0x4c   :  { %506 = vmatpush3.bf16.msra.mxu0 %v576_v1  ;;  %526 = vmatpush3.bf16.msra.mxu1 %v585_v4  ;;  %v581_v9 = vld [vmem:[#allocation5 + $0x28] sm:$0xff]   ;;  %v588_v10 = vld [vmem:[#allocation7 + $0x18] sm:$0xff]   ;;  %v582_v11 = vld [vmem:[#allocation5 + $0x30] sm:$0xff]   ;;  %p694_p5 = scmp.lt.s32.totalorder %s437_s30, %s437_s30 }
  0x4d   :  { %507 = vmatprep.subr.bf16.mxu0 %v725_v0  ;;  %527 = vmatprep.subr.bf16.mxu1 %v725_v0  ;;  %v589_v12 = vld [vmem:[#allocation7 + $0x20] sm:$0xff]   ;;  %v583_v13 = vld [vmem:[#allocation5 + $0x38] sm:$0xff]   ;;  %v590_v14 = vld [vmem:[#allocation7 + $0x28] sm:$0xff]  }
  0x4e   :  { %v584_v15 = vld [vmem:[#allocation2] sm:$0xff]   ;;  %v591_v16 = vld [vmem:[#allocation7 + $0x30] sm:$0xff]   ;;  %v593_v18 = vld [vmem:[#allocation8] sm:$0xff]  }
  0x4f   :  { %v592_v17 = vld [vmem:[#allocation7 + $0x38] sm:$0xff]   ;;  %v594_v19 = vld [vmem:[#allocation8 + $0x8] sm:$0xff]   ;;  %v595_v20 = vld [vmem:[#allocation8 + $0x10] sm:$0xff]  }
  0x50   :  { %508 = vmatpush3.bf16.msra.mxu0 %v577_v2  ;;  %528 = vmatpush3.bf16.msra.mxu1 %v586_v6  ;;  %v596_v21 = vld [vmem:[#allocation8 + $0x18] sm:$0xff]   ;;  %v597_v22 = vld [vmem:[#allocation8 + $0x20] sm:$0xff]   ;;  %v598_v23 = vld [vmem:[#allocation8 + $0x28] sm:$0xff]  }
  0x51   :  { %509 = vmatprep.subr.bf16.mxu0 %v725_v0  ;;  %529 = vmatprep.subr.bf16.mxu1 %v725_v0  ;;  %v450_v24 = vld [vmem:[%s897_s2] ss:$0 sm:$0xff]  ;;  %v599_v32 = vld [vmem:[#allocation8 + $0x30] sm:$0xff]  }
  0x52   :  { %v600_v33 = vld [vmem:[#allocation8 + $0x38] sm:$0xff]  }
  0x53   :  { %v460_v34 = vld [vmem:[%s899_s4] ss:$0 sm:$0xff]  ;;  %s689_s4 = scalar_lea.vmem %s437_s30, 256 }
  0x54   :  { %510 = vmatpush3.bf16.msra.mxu0 %v578_v3  ;;  %530 = vmatpush3.bf16.msra.mxu1 %v587_v8  ;;  %v469_v42 = vld [vmem:[%s901_s6] ss:$0 sm:$0xff]  ;;  %p690_p4 = scmp.ne.s32.totalorder %s437_s30, %s689_s4  ;;  %p695_p6 = scmp.lt.s32.totalorder %s689_s4, %s689_s4 }
  0x55   :  { %511 = vmatprep.subr.bf16.mxu0 %v725_v0  ;;  %531 = vmatprep.subr.bf16.mxu1 %v725_v0 }
  0x56   :  { %p696_p7 = por %p695_p6, %p694_p5 }
  0x58   :  { %512 = vmatpush3.bf16.msra.mxu0 %v579_v5  ;;  %532 = vmatpush3.bf16.msra.mxu1 %v588_v10  ;;  %p697_p8 = pnand %p696_p7, %p690_p4 }
  0x59   :  { %513 = vmatprep.subr.bf16.mxu0 %v725_v0  ;;  %533 = vmatprep.subr.bf16.mxu1 %v725_v0 }
  0x5c   :  { %514 = vmatpush3.bf16.msra.mxu0 %v580_v7  ;;  %534 = vmatpush3.bf16.msra.mxu1 %v589_v12 }
  0x5d   :  { %515 = vmatprep.subr.bf16.mxu0 %v725_v0  ;;  %535 = vmatprep.subr.bf16.mxu1 %v725_v0 }
  0x60   :  { %516 = vmatpush3.bf16.msra.mxu0 %v581_v9  ;;  %536 = vmatpush3.bf16.msra.mxu1 %v590_v14 }
  0x61   :  { %517 = vmatprep.subr.bf16.mxu0 %v725_v0  ;;  %537 = vmatprep.subr.bf16.mxu1 %v725_v0 }
  0x64   :  { %518 = vmatpush3.bf16.msra.mxu0 %v582_v11  ;;  %538 = vmatpush3.bf16.msra.mxu1 %v591_v16 }
  0x65   :  { %519 = vmatprep.subr.bf16.mxu0 %v725_v0  ;;  %539 = vmatprep.subr.bf16.mxu1 %v725_v0 }
  0x68   :  { %520 = vmatpush3.bf16.msra.mxu0 %v583_v13  ;;  %540 = vmatpush3.bf16.msra.mxu1 %v592_v17 }
  0x69   :  { %545 = vmatprep.subr.bf16.mxu0 %v725_v0 }
  0x6b   :  { %522 = vmatmul.mubr.bf16.vlgmr.msra.gmra.mrb[0].mxu0 %v584_v15 }
  0x6c   :  { %561 = vmatprep.mubr.msk.bf16.mxu0 %vm726_vm0, %v725_v0  ;;  %546 = vmatpush3.bf16.msra.mxu0 %v593_v18 }
  0x6d   :  { %547 = vmatprep.subr.bf16.mxu0 %v725_v0 }
  0x70   :  { %548 = vmatpush3.bf16.msra.mxu0 %v594_v19 }
  0x71   :  { %549 = vmatprep.subr.bf16.mxu0 %v725_v0 }
  0x74   :  { %550 = vmatpush3.bf16.msra.mxu0 %v595_v20 }
  0x75   :  { %551 = vmatprep.subr.bf16.mxu0 %v725_v0 }
  0x78   :  { %552 = vmatpush3.bf16.msra.mxu0 %v596_v21 }
  0x79   :  { %553 = vmatprep.subr.bf16.mxu0 %v725_v0 }
  0x7c   :  { %554 = vmatpush3.bf16.msra.mxu0 %v597_v22 }
  0x7d   :  { %555 = vmatprep.subr.bf16.mxu0 %v725_v0 }
  0x80   :  { %556 = vmatpush3.bf16.msra.mxu0 %v598_v23 }
  0x81   :  { %557 = vmatprep.subr.bf16.mxu0 %v725_v0 }
  0x84   :  { %558 = vmatpush3.bf16.msra.mxu0 %v599_v32 }
  0x85   :  { %559 = vmatprep.subr.bf16.mxu0 %v725_v0 }
  0x88   :  { %560 = vmatpush3.bf16.msra.mxu0 %v600_v33 }
 0x13e   :  { %v196_v25 = vpop.f32.mrb[0].mxu0 }
 0x13f   :  { %v523_v26 = vpop.f32.mrb[1].mxu0  ;;  %v197_v28 = vadd.f32 %v450_v24, %v196_v25 }
 0x140   :  { %v199_v27 = vpop.f32.mrb[2].mxu0 }
 0x141   :  { %v200_v29 = vadd.f32 %v450_v24, %v199_v27  ;;  %v524_v30 = vpop.f32.mrb[3].mxu0 }
 0x143   :  { %v203_v31 = vpack.c.bf16 %v200_v29, %v197_v28 }
 0x145   :  { %542 = vmatmul.mubr.bf16.vlgmr.msra.gmra.mrb[0].mxu1 %v203_v31 }
 0x218   :  { %v309_v35 = vpop.f32.mrb[0].mxu1 }
 0x219   :  { %v543_v36 = vpop.f32.mrb[1].mxu1  ;;  %v310_v38 = vadd.f32 %v460_v34, %v309_v35 }
 0x21a   :  { %v312_v37 = vpop.f32.mrb[2].mxu1 }
 0x21b   :  { %v313_v39 = vadd.f32 %v460_v34, %v312_v37  ;;  %v544_v40 = vpop.f32.mrb[3].mxu1 }
 0x21d   :  { %v316_v41 = vpack.c.bf16 %v313_v39, %v310_v38 }
 0x21f   :  { %562 = vmatmul.mubr.bf16.vlgmr.msra.gmra.mrb[4].mxu0 %v316_v41 }
 0x2f2   :  { %v422_v43 = vpop.f32.mrb[4].mxu0 }
 0x2f3   :  { %v423_v44 = vadd.f32 %v469_v42, %v422_v43  ;;  %v563_v45 = vpop.f32.mrb[5].mxu0 }
 0x2f4   :  { %v425_v46 = vpop.f32.mrb[6].mxu0 }
 0x2f5   :  { %429 = vst [vmem:[#allocation10] sm:$0xff] %v423_v44  ;;  %v426_v47 = vadd.f32 %v469_v42, %v425_v46  ;;  %v564_v48 = vpop.f32.mrb[7].mxu0 }
 0x2f7   :  { %430 = vst [vmem:[#allocation10 + $0x8] sm:$0xff] %v426_v47 }
 0x2f8   :  { %700 = shalt.err (!%p697_p8)
}
 0x2f9   :  { %s701_s9 = scalar_lea.hbm %s902_s7, 256 }
 0x2fa   :  { %p702_p9 = scmp.ne.s32.totalorder %s902_s7, %s701_s9  ;;  %p705_p10 = scmp.lt.u32.totalorder %s701_s9, %s902_s7 }
 0x2fc   :  { %p707_p11 = pnand %p705_p10, %p702_p9 }
 0x2fe   :  { %710 = shalt.err (!%p707_p11)
}
 0x2ff   :  { %s728_s16 = smov 128   ;;  %s729_s0 = smov 8  }
 0x300   :  { %442 = dma.vmem_to_hbm [thread:$0]  %s437_s30, 256, %s902_s7, [#allocation4], %s728_s16, %s728_s16, %s729_s0  }
 0x301   :  { %717 = dma.done.wait [#allocation4], 256  }
 0x302   :  { %718 = vsyncadd [#allocation4], 4294967040 }
 0x303   :  { %446 = vsyncpa [#allocation3], 1 }
 0x304   :  { %447 = vsyncpa [#allocation6], 1 }
 0x305   :  { %448 = vsyncpa [#allocation9], 1 }
 0x306   :  { %449 = vsyncpa [#allocation4], 1 }

</bundles_post_ra>
